<compile_context>
chip_gen: v5e
topology: v5e:2x2
jax: 0.10.0
libtpu: 0.0.40
codegen_flags: <defaults>
</compile_context>

<pallas_src>
import jax
import jax.numpy as jnp
from jax.experimental import pallas as pl
from jax.experimental.pallas import tpu as pltpu


# ----------------------------- helpers -----------------------------
def _rolled_rows(c, r, b_dim):
    """result[b] = c[(b - r) % B]  (== torch's repeated cat((c[-1:], c[:-1]))
    == jnp.roll(c, r, axis=0)). `r` and `b_dim` are static Python ints."""
    r = r % b_dim
    if r == 0:
        return c
    if b_dim % 8 == 0:
        # Tile-aligned sublane count: XLU rotate, no VMEM relayout copy.
        return pltpu.roll(c, shift=r, axis=0)
    # Sub-tile B (e.g. the B=4 demo): static slice + concat, always lowers.
    return jnp.concatenate([c[b_dim - r:, :], c[:b_dim - r, :]], axis=0)


# ----------------------------- kernel -----------------------------
def disc_kernel(h_ref, c_ref, w_ref, bias_ref, o_ref):
    # h_ref: (B, H) h_pl            c_ref: (B, H) contexts
    # w_ref: (H, H) bilinear W[0]   bias_ref: (1,) scalar bias in SMEM
    # o_ref: (R+1, B) scores -- rounds on sublanes, batch on the lane axis
    n_rounds, b_dim = o_ref.shape

    # One MXU matmul, f32 accumulation: t[b, h] = sum_k h_pl[b, k] * W[k, h]
    t = jnp.dot(h_ref[...], w_ref[...], preferred_element_type=jnp.float32)   # (B, H)
    c = c_ref[...]
    bias = bias_ref[0]

    for r in range(n_rounds):                       # static unroll; negsamp_round is small
        c_r = _rolled_rows(c, r, b_dim)             # c_r[b] = c[(b - r) % B]
        score = jnp.sum(t * c_r.astype(jnp.float32), axis=1)   # (B,) VPU mul + lane reduce
        o_ref[r, :] = score + bias                  # lane-dense row store per round


# ----------------------------- wrapper -----------------------------
def discriminator_forward(c, h_pl, w_bil, bias_bil, negsamp_round, *, use_bf16_matmul=False):
    """c, h_pl: (B, H); w_bil: (H, H) = torch Bilinear weight[0]; bias_bil: (1,).
    Returns ((negsamp_round + 1) * B, 1) logits in torch.cat (round-major) order."""
    B, H = c.shape
    Rp1 = negsamp_round + 1
    if use_bf16_matmul:
        # Native-rate MXU path on v5e/v6e/v7x; f32 accumulation kept in-kernel.
        # Off by default to preserve exact f32 parity with the torch reference.
        h_pl, c, w_bil = (x.astype(jnp.bfloat16) for x in (h_pl, c, w_bil))

    scores = pl.pallas_call(
        disc_kernel,
        out_shape=jax.ShapeDtypeStruct((Rp1, B), jnp.float32),
        grid=(1,),
        in_specs=[
            pl.BlockSpec((B, H), lambda i: (0, 0)),      # h_pl
            pl.BlockSpec((B, H), lambda i: (0, 0)),      # c
            pl.BlockSpec((H, H), lambda i: (0, 0)),      # bilinear weight
            pl.BlockSpec(memory_space=pltpu.SMEM),       # scalar bias -> SMEM
        ],
        out_specs=pl.BlockSpec((Rp1, B), lambda i: (0, 0)),
    )(h_pl, c, w_bil, bias_bil)
    # (Rp1, B) is already round-major / batch-minor => plain reshape, no transpose.
    return scores.reshape(Rp1 * B, 1)


# --------------- pure-JAX reference (mirrors the torch forward) ---------------
def discriminator_reference(c, h_pl, w_bil, bias_bil, negsamp_round):
    scs = []
    c_mi = c
    for r in range(negsamp_round + 1):
        if r > 0:
            c_mi = jnp.concatenate([c_mi[-1:, :], c_mi[:-1, :]], axis=0)
        s = jnp.einsum("bi,ij,bj->b", h_pl, w_bil, c_mi) + bias_bil[0]
        scs.append(s[:, None])
    return jnp.concatenate(scs, axis=0)


if __name__ == "__main__":
    # Small shapes consistent with the module: batch of subgraph embeddings, hidden=32
    B, H = 4, 32
    NEGSAMP = 2
    key = jax.random.PRNGKey(0)
    k1, k2, k3 = jax.random.split(key, 3)

    # Deterministic init matching the module: xavier_uniform on the (1,H,H) bilinear
    # weight (fan_in = H*H, fan_out = H), bias filled with 0.
    bound = (6.0 / (H * H + H)) ** 0.5
    w_bil = jax.random.uniform(k1, (H, H), jnp.float32, -bound, bound)   # Bilinear weight[0]
    bias_bil = jnp.zeros((1,), jnp.float32)                              # Bilinear bias

    c = jax.random.normal(k2, (B, H), jnp.float32)
    h_pl = jax.random.normal(k3, (B, H), jnp.float32)

    logits = discriminator_forward(c, h_pl, w_bil, bias_bil, NEGSAMP)
    logits = jax.block_until_ready(logits)

    ref = discriminator_reference(c, h_pl, w_bil, bias_bil, NEGSAMP)
    assert logits.shape == ((NEGSAMP + 1) * B, 1), logits.shape
    assert jnp.allclose(logits, ref, atol=1e-4, rtol=1e-4), (logits, ref)

    print("KERNEL_OK")
</pallas_src>

<mosaic_0001>
module attributes {stable_mosaic.version = 11 : i64} {
  func.func @disc_kernel(%arg0: i32, %arg1: memref<4x32xf32, #tpu.memory_space<vmem>>, %arg2: memref<4x32xf32, #tpu.memory_space<vmem>>, %arg3: memref<32x32xf32, #tpu.memory_space<vmem>>, %arg4: memref<1xf32, #tpu.memory_space<smem>>, %arg5: memref<3x4xf32, #tpu.memory_space<vmem>>) attributes {dimension_semantics = [#tpu.dimension_semantics<arbitrary>], iteration_bounds = array<i64: 1>, scalar_prefetch = 0 : i64, scratch_operands = 0 : i64, tpu.core_type = #tpu.core_type<tc>, window_params = [{pipeline_mode = #tpu.pipeline_mode<synchronous>, transform_indices = @transform_0, window_bounds = array<i64: 4, 32>}, {pipeline_mode = #tpu.pipeline_mode<synchronous>, transform_indices = @transform_1, window_bounds = array<i64: 4, 32>}, {pipeline_mode = #tpu.pipeline_mode<synchronous>, transform_indices = @transform_2, window_bounds = array<i64: 32, 32>}, {transform_indices = @transform_3, window_bounds = array<i64: 1>}, {pipeline_mode = #tpu.pipeline_mode<synchronous>, transform_indices = @transform_4, window_bounds = array<i64: 3, 4>}]} {
    %c0 = arith.constant 0 : index
    %c0_0 = arith.constant 0 : index
    %0 = vector.load %arg1[%c0, %c0_0] : memref<4x32xf32, #tpu.memory_space<vmem>>, vector<4x32xf32>
    %c0_1 = arith.constant 0 : index
    %c0_2 = arith.constant 0 : index
    %1 = vector.load %arg3[%c0_1, %c0_2] : memref<32x32xf32, #tpu.memory_space<vmem>>, vector<32x32xf32>
    %cst = arith.constant dense<0.000000e+00> : vector<4x32xf32>
    %2 = tpu.matmul %0, %1, %cst {dimension_numbers = #tpu.dot_dimension_numbers<[1], [0], [0], [1], [0, 0, 1, 1], [], []>} : vector<4x32xf32>, vector<32x32xf32>, vector<4x32xf32> -> vector<4x32xf32>
    %c0_3 = arith.constant 0 : index
    %c0_4 = arith.constant 0 : index
    %3 = vector.load %arg2[%c0_3, %c0_4] : memref<4x32xf32, #tpu.memory_space<vmem>>, vector<4x32xf32>
    %c0_5 = arith.constant 0 : index
    %4 = memref.load %arg4[%c0_5] : memref<1xf32, #tpu.memory_space<smem>>
    %5 = arith.mulf %2, %3 : vector<4x32xf32>
    %cst_6 = arith.constant dense<0.000000e+00> : vector<4xf32>
    %6 = vector.multi_reduction <add>, %5, %cst_6 [1] : vector<4x32xf32> to vector<4xf32>
    %7 = vector.broadcast %4 : f32 to vector<4xf32>
    %8 = arith.addf %6, %7 : vector<4xf32>
    %c0_7 = arith.constant 0 : index
    %c0_8 = arith.constant 0 : index
    %9 = vector.load %arg5[%c0_7, %c0_8] : memref<3x4xf32, #tpu.memory_space<vmem>>, vector<1x4xf32>
    %10 = vector.shape_cast %9 : vector<1x4xf32> to vector<4xf32>
    %11 = vector.shape_cast %8 : vector<4xf32> to vector<1x4xf32>
    tpu.vector_store %arg5[%c0_7, %c0_8], %11 {strides = array<i32>} : memref<3x4xf32, #tpu.memory_space<vmem>>, vector<1x4xf32>,
    %12 = vector.extract_strided_slice %3 {offsets = [3, 0], sizes = [1, 32], strides = [1, 1]} : vector<4x32xf32> to vector<1x32xf32>
    %13 = vector.extract_strided_slice %3 {offsets = [0, 0], sizes = [3, 32], strides = [1, 1]} : vector<4x32xf32> to vector<3x32xf32>
    %14 = tpu.concatenate %12, %13 in 0 : vector<1x32xf32>, vector<3x32xf32> -> vector<4x32xf32>
    %15 = arith.mulf %2, %14 : vector<4x32xf32>
    %cst_9 = arith.constant dense<0.000000e+00> : vector<4xf32>
    %16 = vector.multi_reduction <add>, %15, %cst_9 [1] : vector<4x32xf32> to vector<4xf32>
    %17 = vector.broadcast %4 : f32 to vector<4xf32>
    %18 = arith.addf %16, %17 : vector<4xf32>
    %c1 = arith.constant 1 : index
    %c0_10 = arith.constant 0 : index
    %19 = vector.load %arg5[%c1, %c0_10] : memref<3x4xf32, #tpu.memory_space<vmem>>, vector<1x4xf32>
    %20 = vector.shape_cast %19 : vector<1x4xf32> to vector<4xf32>
    %21 = vector.shape_cast %18 : vector<4xf32> to vector<1x4xf32>
    tpu.vector_store %arg5[%c1, %c0_10], %21 {strides = array<i32>} : memref<3x4xf32, #tpu.memory_space<vmem>>, vector<1x4xf32>,
    %22 = vector.extract_strided_slice %3 {offsets = [2, 0], sizes = [2, 32], strides = [1, 1]} : vector<4x32xf32> to vector<2x32xf32>
    %23 = vector.extract_strided_slice %3 {offsets = [0, 0], sizes = [2, 32], strides = [1, 1]} : vector<4x32xf32> to vector<2x32xf32>
    %24 = tpu.concatenate %22, %23 in 0 : vector<2x32xf32>, vector<2x32xf32> -> vector<4x32xf32>
    %25 = arith.mulf %2, %24 : vector<4x32xf32>
    %cst_11 = arith.constant dense<0.000000e+00> : vector<4xf32>
    %26 = vector.multi_reduction <add>, %25, %cst_11 [1] : vector<4x32xf32> to vector<4xf32>
    %27 = vector.broadcast %4 : f32 to vector<4xf32>
    %28 = arith.addf %26, %27 : vector<4xf32>
    %c2 = arith.constant 2 : index
    %c0_12 = arith.constant 0 : index
    %29 = vector.load %arg5[%c2, %c0_12] : memref<3x4xf32, #tpu.memory_space<vmem>>, vector<1x4xf32>
    %30 = vector.shape_cast %29 : vector<1x4xf32> to vector<4xf32>
    %31 = vector.shape_cast %28 : vector<4xf32> to vector<1x4xf32>
    tpu.vector_store %arg5[%c2, %c0_12], %31 {strides = array<i32>} : memref<3x4xf32, #tpu.memory_space<vmem>>, vector<1x4xf32>,
    return
  }
  func.func @transform_0(%arg0: i32) -> (i32, i32) {
    %c0_i32 = arith.constant 0 : i32
    %c0_i32_0 = arith.constant 0 : i32
    %c0_i32_1 = arith.constant 0 : i32
    return %c0_i32, %c0_i32_0 : i32, i32
  }
  func.func @transform_1(%arg0: i32) -> (i32, i32) {
    %c0_i32 = arith.constant 0 : i32
    %c0_i32_0 = arith.constant 0 : i32
    %c0_i32_1 = arith.constant 0 : i32
    return %c0_i32, %c0_i32_0 : i32, i32
  }
  func.func @transform_2(%arg0: i32) -> (i32, i32) {
    %c0_i32 = arith.constant 0 : i32
    %c0_i32_0 = arith.constant 0 : i32
    %c0_i32_1 = arith.constant 0 : i32
    return %c0_i32, %c0_i32_0 : i32, i32
  }
  func.func @transform_3(%arg0: i32) -> i32 {
    %c0_i32 = arith.constant 0 : i32
    %c0_i32_0 = arith.constant 0 : i32
    return %c0_i32 : i32
  }
  func.func @transform_4(%arg0: i32) -> (i32, i32) {
    %c0_i32 = arith.constant 0 : i32
    %c0_i32_0 = arith.constant 0 : i32
    %c0_i32_1 = arith.constant 0 : i32
    return %c0_i32, %c0_i32_0 : i32, i32
  }
}

</mosaic_0001>

<bundles_post_ra>
// kernel: tpu_custom_call.1
= control target key start
LH: loop header
LB: loop body
LE: loop exit
PB: predicated region body
PF: predicated region fallthrough
CT: control target
= control target key end

     0   :  { %10 = vsyncpa [#allocation4], 0  ;;  %s311_s0 = inlined_call_operand.hbm [shape: f32[4,32], index: 0, kind: input, shape index: {}]   ;;  %s312_s1 = inlined_call_operand.hbm [shape: f32[4,32], index: 1, kind: input, shape index: {}]   ;;  %s313_s2 = inlined_call_operand.hbm [shape: f32[32,32], index: 2, kind: input, shape index: {}]   ;;  %s314_s3 = inlined_call_operand.<no memory space> [shape: f32[1], index: 3, kind: input, shape index: {}]   ;;  %s315_s4 = inlined_call_operand.hbm [shape: f32[3,4], index: 4, kind: output, shape index: {}]  }
   0x1   :  { %11 = vsyncpa [#allocation7], 0  ;;  %s29_s17 = sshll.u32 %s312_s1, 4  ;;  %s30_s17 = int_to_ptr.hbm [resolvable:$true] %s29_s17 }
   0x2   :  { %12 = vsyncpa [#allocation5], 0  ;;  %s265_s18 = smov [#allocation6]   ;;  %s18_s22 = sshll.u32 %s311_s0, 4  ;;  %s19_s22 = int_to_ptr.hbm [resolvable:$true] %s18_s22 }
   0x3   :  { %s31_s19 = sshll.u32 %s265_s18, 4  ;;  %s266_s23 = smov [#allocation3]   ;;  %s32_s19 = int_to_ptr.vmem [resolvable:$true] %s31_s19 }
   0x4   :  { %34 = dma.hbm_to_vmem [thread:$0]  %s30_s17, 64, %s32_s19, [#allocation7]  }
   0x5   :  { %s20_s24 = sshll.u32 %s266_s23, 4  ;;  %s39_s27 = sshll.u32 %s313_s2, 4  ;;  %s21_s24 = int_to_ptr.vmem [resolvable:$true] %s20_s24  ;;  %s40_s27 = int_to_ptr.hbm [resolvable:$true] %s39_s27 }
   0x6   :  { %23 = dma.hbm_to_vmem [thread:$0]  %s19_s22, 64, %s21_s24, [#allocation4]  }
   0x7   :  { %s267_s1 = smov [#allocation8]   ;;  %s268_s29 = smov 128  }
   0x8   :  { %s41_s28 = sshll.u32 %s267_s1, 4  ;;  %s269_s30 = smov 8   ;;  %s42_s28 = int_to_ptr.vmem [resolvable:$true] %s41_s28 }
   0x9   :  { %47 = dma.hbm_to_vmem [thread:$0]  %s40_s27, 512, %s42_s28, [#allocation7], %s268_s29, %s268_s29, %s269_s30  }
   0xa   :  { %259 = dma.done.wait [#allocation4], 64  }
   0xb   :  { %260 = vsyncadd [#allocation4], 4294967232 }
   0xc   :  { %261 = dma.done.wait [#allocation7], 576  }
   0xd   :  { %262 = vsyncadd [#allocation7], 4294966720  ;;  %v66_v0 = vld [vmem:[#allocation8 + $0x18] sm:$0xff]  ;;  %v65_v1 = vld [vmem:[#allocation8 + $0x10] sm:$0xff]  ;;  %vm67_vm0 = vcmask 261120   ;;  %vm127_vm1 = vcmask 1041408   ;;  %v101_v19 = vlaneseq  ;;  %v98_v20 = vstv %s314_s3 }
   0xe   :  { %83 = vmatpush.msra.mxu0 %v66_v0  ;;  %v64_v2 = vld [vmem:[#allocation8 + $0x8] sm:$0xff]  ;;  %v63_v3 = vld [vmem:[#allocation8] sm:$0xff]  ;;  %v62_v4 = vld [vmem:[#allocation3] sm:$0xf]  ;;  %vm94_vm2 = vcmask 257024   ;;  %vm112_vm3 = vcmask 1040384  }
   0xf   :  { %v91_v5 = vld [vmem:[#allocation6] sm:$0xf]  ;;  %v102_v21 = vand.u32 127, %v101_v19  ;;  %vm105_vm4 = vcmask 24576   ;;  %s270_s5 = smov [#allocation9]   ;;  %s145_s9 = sshll.u32 %s315_s4, 4  ;;  %s146_s9 = int_to_ptr.hbm [resolvable:$true] %s145_s9 }
  0x10   :  { %84 = vmatpush.msra.mxu0 %v65_v1  ;;  %v123_v6 = vrot.slane %v91_v5, 2  ;;  %v125_v7 = vrot.slane %v91_v5, 6  ;;  %v108_v10 = vrot.slane %v91_v5, 3  ;;  %v110_v11 = vrot.slane %v91_v5, 7  ;;  %s143_s6 = sshll.u32 %s270_s5, 4  ;;  %s144_s6 = int_to_ptr.vmem [resolvable:$true] %s143_s6 }
  0x12   :  { %85 = vmatpush.msra.mxu0 %v64_v2  ;;  %v128_v8 = vsel %vm127_vm1, %v123_v6, %v125_v7  ;;  %v113_v16 = vsel %vm112_vm3, %v108_v10, %v110_v11 }
  0x14   :  { %86 = vmatpush.msra.mxu0 %v63_v3 }
  0x15   :  { %156 = vmatmul.msk.f32.vlgmr.msra.gmra.mxu0 %vm67_vm0, %v62_v4 }
  0x92   :  { %v88_v9 = vpop.f32.mrf.mxu0 }
  0x93   :  { %v129_v12 = vmul.f32 %v128_v8, %v88_v9  ;;  %v93_v13 = vmul.f32 %v91_v5, %v88_v9  ;;  %v114_v17 = vmul.f32 %v113_v16, %v88_v9 }
  0x95   :  { %v130_v14 = vsel %vm94_vm2, %v129_v12, 0.0  ;;  %v95_v15 = vsel %vm94_vm2, %v93_v13, 0.0  ;;  %v115_v18 = vsel %vm94_vm2, %v114_v17, 0.0 }
  0x96   :  { %131 = vadd.xlane.f32.xlu1 %v130_v14  ;;  %96 = vadd.xlane.f32.xlu0 %v95_v15 }
  0x9e   :  { %116 = vadd.xlane.f32.xlu0 %v115_v18 }
 0x109   :  { %v132_v22 = vpop.xlane.xlu1 %131  ;;  %v97_v23 = vpop.xlane.xlu0 %96 }
 0x10a   :  { %v133_v24 = vadd.f32 %v132_v22, %v98_v20  ;;  %v99_v25 = vadd.f32 %v98_v20, %v97_v23 }
 0x10c   :  { %v135_v26 = vperm.slane %v133_v24, %v102_v21  ;;  %v103_v27 = vperm.slane %v99_v25, %v102_v21 }
 0x10e   :  { %137 = vst.msk [vmem:[#allocation9 + $0x2] sm:$0x1] %vm105_vm4, %v135_v26 }
 0x10f   :  { %106 = vst.msk [vmem:[#allocation9] sm:$0x1] %vm105_vm4, %v103_v27 }
 0x111   :  { %v117_v28 = vpop.xlane.xlu0 %116 }
 0x112   :  { %v118_v29 = vadd.f32 %v117_v28, %v98_v20 }
 0x114   :  { %v120_v30 = vperm.slane %v118_v29, %v102_v21 }
 0x116   :  { %122 = vst.msk [vmem:[#allocation9 + $0x1] sm:$0x1] %vm105_vm4, %v120_v30 }
 0x117   :  { %148 = dma.vmem_to_hbm [thread:$0]  %s144_s6, 64, %s146_s9, [#allocation5]  }
 0x118   :  { %263 = dma.done.wait [#allocation5], 64  }
 0x119   :  { %264 = vsyncadd [#allocation5], 4294967232 }
 0x11a   :  { %153 = vsyncpa [#allocation4], 1 }
 0x11b   :  { %154 = vsyncpa [#allocation7], 1 }
 0x11c   :  { %155 = vsyncpa [#allocation5], 1 }

</bundles_post_ra>
